<compile_context>
chip_gen: v5e
topology: v5e:2x2
jax: 0.10.0
libtpu: 0.0.40
codegen_flags: <defaults>
</compile_context>

<pallas_src>
import functools

import jax
import jax.numpy as jnp
from jax import lax
from jax.experimental import pallas as pl
from jax.experimental.pallas import tpu as pltpu


# ---------------------------------------------------------------------------
# Fused kernel: k x k conv (stride 1, groups 1, no bias) + BN(train) + ReLU.
# ---------------------------------------------------------------------------
def _fused_conv_bn_relu_kernel(x_ref, w_ref, gamma_ref, beta_ref, o_ref, *scratch,
                               k, p, Ho, Wo, eps):
    # x_ref:      (N, H, W, Cin)   NHWC input (whole array, VMEM resident)
    # w_ref:      (k*k*Cin, Cp)    conv weight, HWIO flattened, Cout padded to Cp
    # gamma/beta: (1, Cp)          BN affine params (zero padded, f32)
    # o_ref:      (N*Ho*Wo, Cp)    lane-dense output slab
    N, H, W, Cin = x_ref.shape
    Cp = o_ref.shape[1]
    M = N * Ho * Wo

    if p > 0:
        # In-kernel zero padding on a VMEM scratch (no HBM round-trip).
        (xpad_ref,) = scratch
        xpad_ref[...] = jnp.zeros_like(xpad_ref)
        xpad_ref[:, p:p + H, p:p + W, :] = x_ref[...]
        src = xpad_ref
    else:
        src = x_ref

    # Conv as k*k MXU matmuls over shifted taps, accumulated in f32.
    # Native-dtype operands into the MXU; f32 accumulation.
    acc = jnp.zeros((M, Cp), jnp.float32)
    for dh in range(k):
        for dw in range(k):
            xs = src[:, dh:dh + Ho, dw:dw + Wo, :].reshape(M, Cin)
            wblk = w_ref[(dh * k + dw) * Cin:(dh * k + dw + 1) * Cin, :]
            acc = acc + jnp.dot(xs, wblk, preferred_element_type=jnp.float32)

    # BatchNorm2d (training mode): one-pass biased batch stats over N*Ho*Wo,
    # folded into a single per-channel scale/bias (y = acc * scale + bias).
    inv_m = jnp.float32(1.0 / M)
    mean = jnp.sum(acc, axis=0, keepdims=True) * inv_m           # (1, Cp)
    var = jnp.sum(acc * acc, axis=0, keepdims=True) * inv_m - mean * mean
    scale = gamma_ref[...] * lax.rsqrt(var + eps)                # (1, Cp)
    bias = beta_ref[...] - mean * scale                          # (1, Cp)
    o_ref[...] = jnp.maximum(acc * scale + bias, 0.0).astype(o_ref.dtype)


# ---------------------------------------------------------------------------
# Wrapper: NCHW in / NCHW out, matching the PyTorch module exactly.
# ---------------------------------------------------------------------------
@functools.partial(jax.jit, static_argnames=("k", "s", "p", "g", "eps"))
def conv_bn_relu(x_nchw, weight, gamma, beta, *, k=1, s=1, p=0, g=1, eps=1e-3):
    """Forward of the PyTorch `Conv` module (training-mode BatchNorm)."""
    assert s == 1, "TODO(synk): stride > 1 not implemented"
    assert g == 1, "TODO(synk): groups > 1 not implemented"
    N, Cin, H, W = x_nchw.shape
    Cout = weight.shape[0]
    assert weight.shape == (Cout, Cin, k, k)
    Ho, Wo = H + 2 * p - k + 1, W + 2 * p - k + 1

    # Lane-dense output: pad the out-channel axis to a multiple of 128.
    Cp = ((Cout + 127) // 128) * 128
    w = jnp.transpose(weight, (2, 3, 1, 0)).reshape(k * k * Cin, Cout)
    w = jnp.pad(w, ((0, 0), (0, Cp - Cout)))
    gpad = jnp.pad(gamma.astype(jnp.float32), (0, Cp - Cout)).reshape(1, Cp)
    bpad = jnp.pad(beta.astype(jnp.float32), (0, Cp - Cout)).reshape(1, Cp)

    x_nhwc = jnp.transpose(x_nchw, (0, 2, 3, 1))

    scratch = []
    if p > 0:
        scratch.append(pltpu.VMEM((N, H + 2 * p, W + 2 * p, Cin), x_nhwc.dtype))

    kernel = functools.partial(_fused_conv_bn_relu_kernel,
                               k=k, p=p, Ho=Ho, Wo=Wo, eps=eps)
    out = pl.pallas_call(
        kernel,
        out_shape=jax.ShapeDtypeStruct((N * Ho * Wo, Cp), x_nchw.dtype),
        scratch_shapes=scratch,
    )(x_nhwc, w, gpad, bpad)

    out = out.reshape(N, Ho, Wo, Cp)[..., :Cout]
    return jnp.transpose(out, (0, 3, 1, 2))


# ---------------------------------------------------------------------------
# Pure-JAX reference (for the in-script correctness check).
# ---------------------------------------------------------------------------
def _reference(x_nchw, weight, gamma, beta, *, p, eps=1e-3):
    y = lax.conv_general_dilated(
        x_nchw, weight, window_strides=(1, 1), padding=((p, p), (p, p)),
        dimension_numbers=("NCHW", "OIHW", "NCHW"),
        precision=lax.Precision.HIGHEST)
    mean = jnp.mean(y, axis=(0, 2, 3), keepdims=True)
    var = jnp.mean((y - mean) ** 2, axis=(0, 2, 3), keepdims=True)
    y = (y - mean) * lax.rsqrt(var + eps)
    y = y * gamma.reshape(1, -1, 1, 1) + beta.reshape(1, -1, 1, 1)
    return jnp.maximum(y, 0.0)


if __name__ == "__main__":
    key = jax.random.PRNGKey(0)
    N, Cin, H, W = 2, 32, 16, 16
    Cout = 64

    key, kx, kw1, kw3, kg, kb = jax.random.split(key, 6)
    x = jax.random.normal(kx, (N, Cin, H, W), jnp.float32)
    # Case 1: module defaults  Conv(32, 64)           -> k=1, s=1, p=0, g=1
    w1 = 0.1 * jax.random.normal(kw1, (Cout, Cin, 1, 1), jnp.float32)
    # Case 2: common usage     Conv(32, 64, k=3, p=1) -> 3x3 "same" conv
    w3 = 0.1 * jax.random.normal(kw3, (Cout, Cin, 3, 3), jnp.float32)
    gamma = 1.0 + 0.1 * jax.random.normal(kg, (Cout,), jnp.float32)
    beta = 0.1 * jax.random.normal(kb, (Cout,), jnp.float32)

    for wgt, ksz, pad in ((w1, 1, 0), (w3, 3, 1)):
        out = conv_bn_relu(x, wgt, gamma, beta, k=ksz, p=pad)
        jax.block_until_ready(out)
        ref = _reference(x, wgt, gamma, beta, p=pad)
        assert out.shape == ref.shape, (out.shape, ref.shape)
        err = float(jnp.max(jnp.abs(out - ref)))
        assert err < 5e-2, f"max abs err {err} for k={ksz}"

    print("KERNEL_OK")
</pallas_src>

<mosaic_0001>
module attributes {stable_mosaic.version = 11 : i64} {
  func.func @_fused_conv_bn_relu_kernel(%arg0: memref<2x16x16x32xf32, #tpu.memory_space<vmem>>, %arg1: memref<32x128xf32, #tpu.memory_space<vmem>>, %arg2: memref<1x128xf32, #tpu.memory_space<vmem>>, %arg3: memref<1x128xf32, #tpu.memory_space<vmem>>, %arg4: memref<512x128xf32, #tpu.memory_space<vmem>>) attributes {dimension_semantics = [], scalar_prefetch = 0 : i64, scratch_operands = 0 : i64, tpu.core_type = #tpu.core_type<tc>} {
    %cst = arith.constant 0.000000e+00 : f32
    %0 = vector.broadcast %cst : f32 to vector<512x128xf32>
    %c0 = arith.constant 0 : index
    %c0_0 = arith.constant 0 : index
    %c0_1 = arith.constant 0 : index
    %c0_2 = arith.constant 0 : index
    %1 = vector.load %arg0[%c0, %c0_0, %c0_1, %c0_2] : memref<2x16x16x32xf32, #tpu.memory_space<vmem>>, vector<2x16x16x32xf32>
    %2 = vector.shape_cast %1 : vector<2x16x16x32xf32> to vector<512x32xf32>
    %c0_3 = arith.constant 0 : index
    %c0_4 = arith.constant 0 : index
    %3 = vector.load %arg1[%c0_3, %c0_4] : memref<32x128xf32, #tpu.memory_space<vmem>>, vector<32x128xf32>
    %cst_5 = arith.constant dense<0.000000e+00> : vector<512x128xf32>
    %4 = tpu.matmul %2, %3, %cst_5 {dimension_numbers = #tpu.dot_dimension_numbers<[1], [0], [0], [1], [0, 0, 1, 1], [], []>} : vector<512x32xf32>, vector<32x128xf32>, vector<512x128xf32> -> vector<512x128xf32>
    %5 = arith.addf %0, %4 : vector<512x128xf32>
    %cst_6 = arith.constant dense<0.000000e+00> : vector<128xf32>
    %6 = vector.multi_reduction <add>, %5, %cst_6 [0] : vector<512x128xf32> to vector<128xf32>
    %7 = vector.shape_cast %6 : vector<128xf32> to vector<1x128xf32>
    %cst_7 = arith.constant 0.001953125 : f32
    %8 = vector.broadcast %cst_7 : f32 to vector<1x128xf32>
    %9 = arith.mulf %7, %8 : vector<1x128xf32>
    %10 = arith.mulf %5, %5 : vector<512x128xf32>
    %cst_8 = arith.constant dense<0.000000e+00> : vector<128xf32>
    %11 = vector.multi_reduction <add>, %10, %cst_8 [0] : vector<512x128xf32> to vector<128xf32>
    %12 = vector.shape_cast %11 : vector<128xf32> to vector<1x128xf32>
    %cst_9 = arith.constant 0.001953125 : f32
    %13 = vector.broadcast %cst_9 : f32 to vector<1x128xf32>
    %14 = arith.mulf %12, %13 : vector<1x128xf32>
    %15 = arith.mulf %9, %9 : vector<1x128xf32>
    %16 = arith.subf %14, %15 : vector<1x128xf32>
    %c0_10 = arith.constant 0 : index
    %c0_11 = arith.constant 0 : index
    %17 = vector.load %arg2[%c0_10, %c0_11] : memref<1x128xf32, #tpu.memory_space<vmem>>, vector<1x128xf32>
    %cst_12 = arith.constant 1.000000e-03 : f32
    %18 = vector.broadcast %cst_12 : f32 to vector<1x128xf32>
    %19 = arith.addf %16, %18 : vector<1x128xf32>
    %20 = math.rsqrt %19 : vector<1x128xf32>
    %21 = arith.mulf %17, %20 : vector<1x128xf32>
    %c0_13 = arith.constant 0 : index
    %c0_14 = arith.constant 0 : index
    %22 = vector.load %arg3[%c0_13, %c0_14] : memref<1x128xf32, #tpu.memory_space<vmem>>, vector<1x128xf32>
    %23 = arith.mulf %9, %21 : vector<1x128xf32>
    %24 = arith.subf %22, %23 : vector<1x128xf32>
    %25 = vector.broadcast %21 : vector<1x128xf32> to vector<512x128xf32>
    %26 = arith.mulf %5, %25 : vector<512x128xf32>
    %27 = vector.broadcast %24 : vector<1x128xf32> to vector<512x128xf32>
    %28 = arith.addf %26, %27 : vector<512x128xf32>
    %cst_15 = arith.constant 0.000000e+00 : f32
    %29 = vector.broadcast %cst_15 : f32 to vector<512x128xf32>
    %30 = arith.maximumf %28, %29 : vector<512x128xf32>
    %c0_16 = arith.constant 0 : index
    %c0_17 = arith.constant 0 : index
    %31 = vector.load %arg4[%c0_16, %c0_17] : memref<512x128xf32, #tpu.memory_space<vmem>>, vector<512x128xf32>
    tpu.vector_store %arg4[%c0_16, %c0_17], %30 {strides = array<i32>} : memref<512x128xf32, #tpu.memory_space<vmem>>, vector<512x128xf32>,
    return
  }
}

</mosaic_0001>

<bundles_post_ra>
// kernel: conv_bn_relu.1
= control target key start
LH: loop header
LB: loop body
LE: loop exit
PB: predicated region body
PF: predicated region fallthrough
CT: control target
= control target key end

     0   :  { %9 = vsyncpa [#allocation3], 0  ;;  %s1099_s18 = smov [#allocation2]   ;;  %s1100_s20 = smov 128   ;;  %s1917_s0 = inlined_call_operand.hbm [shape: f32[2,16,16,32], index: 0, kind: input, shape index: {}]   ;;  %s1918_s1 = inlined_call_operand.vmem [shape: f32[32,128], index: 1, kind: input, shape index: {}]   ;;  %s1919_s2 = inlined_call_operand.vmem [shape: f32[1,128], index: 2, kind: input, shape index: {}]   ;;  %s1920_s3 = inlined_call_operand.vmem [shape: f32[1,128], index: 3, kind: input, shape index: {}]   ;;  %s1921_s4 = inlined_call_operand.vmem [shape: f32[512,128], index: 4, kind: output, shape index: {}]  }
   0x1   :  { %s14_s17 = sshll.u32 %s1917_s0, 4  ;;  %s16_s19 = sshll.u32 %s1099_s18, 4  ;;  %s15_s17 = int_to_ptr.hbm [resolvable:$true] %s14_s17  ;;  %s17_s19 = int_to_ptr.vmem [resolvable:$true] %s16_s19 }
   0x2   :  { %s1101_s21 = smov 8  }
   0x3   :  { %22 = dma.hbm_to_vmem [thread:$0]  %s15_s17, 8192, %s17_s19, [#allocation3], %s1100_s20, %s1100_s20, %s1101_s21  }
   0x4   :  { %1097 = dma.done.wait [#allocation3], 8192  }
   0x5   :  { %1098 = vsyncadd [#allocation3], 4294959104  ;;  %v100_v0 = vld [vmem:[%s1918_s1 + $0x18] sm:$0xff]  ;;  %v99_v1 = vld [vmem:[%s1918_s1 + $0x10] sm:$0xff]  ;;  %vm101_vm0 = vcmask 261120  }
   0x6   :  { %306 = vmatpush.msra.mxu0 %v100_v0  ;;  %1056 = vmatpush.msra.mxu1 %v100_v0  ;;  %v98_v2 = vld [vmem:[%s1918_s1 + $0x8] sm:$0xff]  ;;  %v97_v3 = vld [vmem:[%s1918_s1] sm:$0xff]  ;;  %v35_v8 = vld [vmem:[#allocation2 + $0x10] sm:$0xff] }
   0x7   :  { %1057 = vmatpush.msra.mxu2 %v100_v0  ;;  %1058 = vmatpush.msra.mxu3 %v100_v0  ;;  %v33_v4 = vld [vmem:[#allocation2] sm:$0xff]  ;;  %v34_v6 = vld [vmem:[#allocation2 + $0x8] sm:$0xff]  ;;  %v51_v9 = vld [vmem:[#allocation2 + $0x90] sm:$0xff] }
   0x8   :  { %307 = vmatpush.msra.mxu0 %v99_v1  ;;  %1059 = vmatpush.msra.mxu1 %v99_v1  ;;  %v49_v5 = vld [vmem:[#allocation2 + $0x80] sm:$0xff]  ;;  %v50_v7 = vld [vmem:[#allocation2 + $0x88] sm:$0xff]  ;;  %v36_v10 = vld [vmem:[#allocation2 + $0x18] sm:$0xff] }
   0x9   :  { %1060 = vmatpush.msra.mxu2 %v99_v1  ;;  %1061 = vmatpush.msra.mxu3 %v99_v1  ;;  %v52_v11 = vld [vmem:[#allocation2 + $0x98] sm:$0xff]  ;;  %v65_v12 = vld [vmem:[#allocation2 + $0x100] sm:$0xff]  ;;  %v66_v15 = vld [vmem:[#allocation2 + $0x108] sm:$0xff] }
   0xa   :  { %308 = vmatpush.msra.mxu0 %v98_v2  ;;  %1062 = vmatpush.msra.mxu1 %v98_v2  ;;  %v37_v13 = vld [vmem:[#allocation2 + $0x20] sm:$0xff]  ;;  %v38_v16 = vld [vmem:[#allocation2 + $0x28] sm:$0xff]  ;;  %v67_v18 = vld [vmem:[#allocation2 + $0x110] sm:$0xff] }
   0xb   :  { %1063 = vmatpush.msra.mxu2 %v98_v2  ;;  %1064 = vmatpush.msra.mxu3 %v98_v2  ;;  %v53_v14 = vld [vmem:[#allocation2 + $0xa0] sm:$0xff]  ;;  %v54_v17 = vld [vmem:[#allocation2 + $0xa8] sm:$0xff]  ;;  %v39_v19 = vld [vmem:[#allocation2 + $0x30] sm:$0xff] }
   0xc   :  { %309 = vmatpush.msra.mxu0 %v97_v3  ;;  %1065 = vmatpush.msra.mxu1 %v97_v3  ;;  %v55_v20 = vld [vmem:[#allocation2 + $0xb0] sm:$0xff]  ;;  %v68_v21 = vld [vmem:[#allocation2 + $0x118] sm:$0xff]  ;;  %v69_v24 = vld [vmem:[#allocation2 + $0x120] sm:$0xff] }
   0xd   :  { %992 = vmatmul.msk.f32.vlgmr.msra.gmra.mxu0 %vm101_vm0, %v33_v4  ;;  %1008 = vmatmul.msk.f32.vlgmr.msra.gmra.mxu1 %vm101_vm0, %v49_v5  ;;  %v40_v22 = vld [vmem:[#allocation2 + $0x38] sm:$0xff]  ;;  %v81_v25 = vld [vmem:[#allocation2 + $0x180] sm:$0xff]  ;;  %v70_v28 = vld [vmem:[#allocation2 + $0x128] sm:$0xff] }
   0xe   :  { %1066 = vmatpush.msra.mxu2 %v97_v3  ;;  %1067 = vmatpush.msra.mxu3 %v97_v3  ;;  %v56_v23 = vld [vmem:[#allocation2 + $0xb8] sm:$0xff]  ;;  %v41_v26 = vld [vmem:[#allocation2 + $0x40] sm:$0xff]  ;;  %v82_v29 = vld [vmem:[#allocation2 + $0x188] sm:$0xff] }
   0xf   :  { %1024 = vmatmul.msk.f32.vlgmr.msra.gmra.mxu2 %vm101_vm0, %v65_v12  ;;  %1040 = vmatmul.msk.f32.vlgmr.msra.gmra.mxu3 %vm101_vm0, %v81_v25  ;;  %v57_v27 = vld [vmem:[#allocation2 + $0xc0] sm:$0xff]  ;;  %v42_v30 = vld [vmem:[#allocation2 + $0x48] sm:$0xff]  ;;  %v71_v32 = vld [vmem:[#allocation2 + $0x130] sm:$0xff] }
  0x10   :  { %v58_v31 = vld [vmem:[#allocation2 + $0xc8] sm:$0xff]  ;;  %v83_v33 = vld [vmem:[#allocation2 + $0x190] sm:$0xff]  ;;  %v72_v36 = vld [vmem:[#allocation2 + $0x138] sm:$0xff] }
  0x11   :  { %v43_v34 = vld [vmem:[#allocation2 + $0x50] sm:$0xff]  ;;  %v84_v37 = vld [vmem:[#allocation2 + $0x198] sm:$0xff]  ;;  %v73_v40 = vld [vmem:[#allocation2 + $0x140] sm:$0xff] }
  0x12   :  { %v59_v35 = vld [vmem:[#allocation2 + $0xd0] sm:$0xff]  ;;  %v44_v38 = vld [vmem:[#allocation2 + $0x58] sm:$0xff]  ;;  %v85_v41 = vld [vmem:[#allocation2 + $0x1a0] sm:$0xff] }
  0x13   :  { %v60_v39 = vld [vmem:[#allocation2 + $0xd8] sm:$0xff]  ;;  %v45_v42 = vld [vmem:[#allocation2 + $0x60] sm:$0xff]  ;;  %v74_v44 = vld [vmem:[#allocation2 + $0x148] sm:$0xff] }
  0x14   :  { %v61_v43 = vld [vmem:[#allocation2 + $0xe0] sm:$0xff]  ;;  %v86_v45 = vld [vmem:[#allocation2 + $0x1a8] sm:$0xff]  ;;  %v75_v48 = vld [vmem:[#allocation2 + $0x150] sm:$0xff] }
  0x15   :  { %993 = vmatmul.msk.f32.gmra.mxu0 %vm101_vm0, %v34_v6  ;;  %1009 = vmatmul.msk.f32.gmra.mxu1 %vm101_vm0, %v50_v7  ;;  %v46_v46 = vld [vmem:[#allocation2 + $0x68] sm:$0xff]  ;;  %v87_v49 = vld [vmem:[#allocation2 + $0x1b0] sm:$0xff]  ;;  %v76_v52 = vld [vmem:[#allocation2 + $0x158] sm:$0xff] }
  0x16   :  { %v62_v47 = vld [vmem:[#allocation2 + $0xe8] sm:$0xff]  ;;  %v47_v50 = vld [vmem:[#allocation2 + $0x70] sm:$0xff]  ;;  %v88_v53 = vld [vmem:[#allocation2 + $0x1b8] sm:$0xff] }
  0x17   :  { %1025 = vmatmul.msk.f32.gmra.mxu2 %vm101_vm0, %v66_v15  ;;  %1041 = vmatmul.msk.f32.gmra.mxu3 %vm101_vm0, %v82_v29  ;;  %v63_v51 = vld [vmem:[#allocation2 + $0xf0] sm:$0xff]  ;;  %v48_v54 = vld [vmem:[#allocation2 + $0x78] sm:$0xff]  ;;  %v77_v56 = vld [vmem:[#allocation2 + $0x160] sm:$0xff] }
  0x18   :  { %v64_v55 = vld [vmem:[#allocation2 + $0xf8] sm:$0xff]  ;;  %v89_v57 = vld [vmem:[#allocation2 + $0x1c0] sm:$0xff]  ;;  %v78_v60 = vld [vmem:[#allocation2 + $0x168] sm:$0xff] }
  0x19   :  { %v90_v61 = vld [vmem:[#allocation2 + $0x1c8] sm:$0xff]  ;;  %v79_v0 = vld [vmem:[#allocation2 + $0x170] sm:$0xff]  ;;  %v80_v4 = vld [vmem:[#allocation2 + $0x178] sm:$0xff] }
  0x1a   :  { %v91_v1 = vld [vmem:[#allocation2 + $0x1d0] sm:$0xff]  ;;  %v92_v5 = vld [vmem:[#allocation2 + $0x1d8] sm:$0xff]  ;;  %v93_v7 = vld [vmem:[#allocation2 + $0x1e0] sm:$0xff] }
  0x1b   :  { %v95_v15 = vld [vmem:[#allocation2 + $0x1f0] sm:$0xff] }
  0x1d   :  { %994 = vmatmul.msk.f32.gmra.mxu0 %vm101_vm0, %v35_v8  ;;  %1010 = vmatmul.msk.f32.gmra.mxu1 %vm101_vm0, %v51_v9 }
  0x1f   :  { %1026 = vmatmul.msk.f32.gmra.mxu2 %vm101_vm0, %v67_v18  ;;  %1042 = vmatmul.msk.f32.gmra.mxu3 %vm101_vm0, %v83_v33 }
  0x25   :  { %995 = vmatmul.msk.f32.gmra.mxu0 %vm101_vm0, %v36_v10  ;;  %1011 = vmatmul.msk.f32.gmra.mxu1 %vm101_vm0, %v52_v11  ;;  %v94_v11 = vld [vmem:[#allocation2 + $0x1e8] sm:$0xff] }
  0x27   :  { %1027 = vmatmul.msk.f32.gmra.mxu2 %vm101_vm0, %v68_v21  ;;  %1043 = vmatmul.msk.f32.gmra.mxu3 %vm101_vm0, %v84_v37 }
  0x2d   :  { %996 = vmatmul.msk.f32.gmra.mxu0 %vm101_vm0, %v37_v13  ;;  %1012 = vmatmul.msk.f32.gmra.mxu1 %vm101_vm0, %v53_v14 }
  0x2f   :  { %1028 = vmatmul.msk.f32.gmra.mxu2 %vm101_vm0, %v69_v24  ;;  %1044 = vmatmul.msk.f32.gmra.mxu3 %vm101_vm0, %v85_v41 }
  0x35   :  { %997 = vmatmul.msk.f32.gmra.mxu0 %vm101_vm0, %v38_v16  ;;  %1013 = vmatmul.msk.f32.gmra.mxu1 %vm101_vm0, %v54_v17 }
  0x37   :  { %1029 = vmatmul.msk.f32.gmra.mxu2 %vm101_vm0, %v70_v28  ;;  %1045 = vmatmul.msk.f32.gmra.mxu3 %vm101_vm0, %v86_v45 }
  0x3d   :  { %998 = vmatmul.msk.f32.gmra.mxu0 %vm101_vm0, %v39_v19  ;;  %1014 = vmatmul.msk.f32.gmra.mxu1 %vm101_vm0, %v55_v20  ;;  %v96_v19 = vld [vmem:[#allocation2 + $0x1f8] sm:$0xff] }
  0x3f   :  { %1030 = vmatmul.msk.f32.gmra.mxu2 %vm101_vm0, %v71_v32  ;;  %1046 = vmatmul.msk.f32.gmra.mxu3 %vm101_vm0, %v87_v49 }
  0x45   :  { %999 = vmatmul.msk.f32.gmra.mxu0 %vm101_vm0, %v40_v22  ;;  %1015 = vmatmul.msk.f32.gmra.mxu1 %vm101_vm0, %v56_v23 }
  0x47   :  { %1031 = vmatmul.msk.f32.gmra.mxu2 %vm101_vm0, %v72_v36  ;;  %1047 = vmatmul.msk.f32.gmra.mxu3 %vm101_vm0, %v88_v53 }
  0x4d   :  { %1000 = vmatmul.msk.f32.gmra.mxu0 %vm101_vm0, %v41_v26  ;;  %1016 = vmatmul.msk.f32.gmra.mxu1 %vm101_vm0, %v57_v27 }
  0x4f   :  { %1032 = vmatmul.msk.f32.gmra.mxu2 %vm101_vm0, %v73_v40  ;;  %1048 = vmatmul.msk.f32.gmra.mxu3 %vm101_vm0, %v89_v57 }
  0x55   :  { %1001 = vmatmul.msk.f32.gmra.mxu0 %vm101_vm0, %v42_v30  ;;  %1017 = vmatmul.msk.f32.gmra.mxu1 %vm101_vm0, %v58_v31 }
  0x57   :  { %1033 = vmatmul.msk.f32.gmra.mxu2 %vm101_vm0, %v74_v44  ;;  %1049 = vmatmul.msk.f32.gmra.mxu3 %vm101_vm0, %v90_v61 }
  0x5d   :  { %1002 = vmatmul.msk.f32.gmra.mxu0 %vm101_vm0, %v43_v34  ;;  %1018 = vmatmul.msk.f32.gmra.mxu1 %vm101_vm0, %v59_v35 }
  0x5f   :  { %1034 = vmatmul.msk.f32.gmra.mxu2 %vm101_vm0, %v75_v48  ;;  %1050 = vmatmul.msk.f32.gmra.mxu3 %vm101_vm0, %v91_v1 }
  0x65   :  { %1003 = vmatmul.msk.f32.gmra.mxu0 %vm101_vm0, %v44_v38  ;;  %1019 = vmatmul.msk.f32.gmra.mxu1 %vm101_vm0, %v60_v39 }
  0x67   :  { %1035 = vmatmul.msk.f32.gmra.mxu2 %vm101_vm0, %v76_v52  ;;  %1051 = vmatmul.msk.f32.gmra.mxu3 %vm101_vm0, %v92_v5 }
  0x6d   :  { %1004 = vmatmul.msk.f32.gmra.mxu0 %vm101_vm0, %v45_v42  ;;  %1020 = vmatmul.msk.f32.gmra.mxu1 %vm101_vm0, %v61_v43 }
  0x6f   :  { %1036 = vmatmul.msk.f32.gmra.mxu2 %vm101_vm0, %v77_v56  ;;  %1052 = vmatmul.msk.f32.gmra.mxu3 %vm101_vm0, %v93_v7 }
  0x75   :  { %1005 = vmatmul.msk.f32.gmra.mxu0 %vm101_vm0, %v46_v46  ;;  %1021 = vmatmul.msk.f32.gmra.mxu1 %vm101_vm0, %v62_v47 }
  0x77   :  { %1037 = vmatmul.msk.f32.gmra.mxu2 %vm101_vm0, %v78_v60  ;;  %1053 = vmatmul.msk.f32.gmra.mxu3 %vm101_vm0, %v94_v11 }
  0x7d   :  { %1006 = vmatmul.msk.f32.gmra.mxu0 %vm101_vm0, %v47_v50  ;;  %1022 = vmatmul.msk.f32.gmra.mxu1 %vm101_vm0, %v63_v51 }
  0x7f   :  { %1038 = vmatmul.msk.f32.gmra.mxu2 %vm101_vm0, %v79_v0  ;;  %1054 = vmatmul.msk.f32.gmra.mxu3 %vm101_vm0, %v95_v15 }
  0x85   :  { %1007 = vmatmul.msk.f32.gmra.mxu0 %vm101_vm0, %v48_v54  ;;  %1023 = vmatmul.msk.f32.gmra.mxu1 %vm101_vm0, %v64_v55 }
  0x87   :  { %1039 = vmatmul.msk.f32.gmra.mxu2 %vm101_vm0, %v80_v4  ;;  %1055 = vmatmul.msk.f32.gmra.mxu3 %vm101_vm0, %v96_v19 }
  0x8a   :  { %v1196_v58 = vpop.f32.mrf.mxu0  ;;  %v1198_v59 = vpop.f32.mrf.mxu1 }
  0x8b   :  { %v573_v38 = vmul.f32 %v1196_v58, %v1196_v58 }
  0x92   :  { %v1202_v62 = vpop.f32.mrf.mxu0  ;;  %v1204_v63 = vpop.f32.mrf.mxu1 }
  0x93   :  { %v1221_v10 = vpop.f32.mrf.mxu2  ;;  %v1246_v24 = vpop.f32.mrf.mxu3  ;;  %v574_v36 = vmul.f32 %v1202_v62, %v1202_v62  ;;  %v503_v39 = vadd.f32 %v1202_v62, %v1196_v58 }
  0x95   :  { %v637_v41 = vadd.f32 %v574_v36, %v573_v38 }
  0x9a   :  { %v1208_v2 = vpop.f32.mrf.mxu0  ;;  %v1210_v3 = vpop.f32.mrf.mxu1 }
  0x9b   :  { %v1228_v14 = vpop.f32.mrf.mxu2  ;;  %v1254_v28 = vpop.f32.mrf.mxu3  ;;  %v575_v40 = vmul.f32 %v1208_v2, %v1208_v2  ;;  %v504_v42 = vadd.f32 %v503_v39, %v1208_v2 }
  0x9c   :  { %1946 = vst [vmem:[#allocation5_spill] sm:$0xff] %v1228_v14 }
  0x9d   :  { %1950 = vst [vmem:[#allocation9_spill] sm:$0xff] %v1254_v28  ;;  %v638_v45 = vadd.f32 %v637_v41, %v575_v40 }
  0xa2   :  { %v1214_v6 = vpop.f32.mrf.mxu0  ;;  %v1216_v8 = vpop.f32.mrf.mxu1 }
  0xa3   :  { %v1235_v18 = vpop.f32.mrf.mxu2  ;;  %v1262_v32 = vpop.f32.mrf.mxu3  ;;  %v576_v43 = vmul.f32 %v1214_v6, %v1214_v6  ;;  %v505_v46 = vadd.f32 %v504_v42, %v1214_v6 }
  0xa4   :  { %1947 = vst [vmem:[#allocation6_spill] sm:$0xff] %v1235_v18 }
  0xa5   :  { %1952 = vst [vmem:[#allocation11_spill] sm:$0xff] %v1262_v32  ;;  %v639_v49 = vadd.f32 %v638_v45, %v576_v43 }
  0xaa   :  { %v1219_v9 = vpop.f32.mrf.mxu0  ;;  %v1224_v12 = vpop.f32.mrf.mxu1 }
  0xab   :  { %v1242_v22 = vpop.f32.mrf.mxu2  ;;  %v1272_v37 = vpop.f32.mrf.mxu3  ;;  %v577_v47 = vmul.f32 %v1219_v9, %v1219_v9  ;;  %v506_v50 = vadd.f32 %v505_v46, %v1219_v9 }
  0xac   :  { %1948 = vst [vmem:[#allocation7_spill] sm:$0xff] %v1242_v22 }
  0xad   :  { %v640_v53 = vadd.f32 %v639_v49, %v577_v47 }
  0xb2   :  { %v1226_v13 = vpop.f32.mrf.mxu0  ;;  %v1233_v17 = vpop.f32.mrf.mxu1 }
  0xb3   :  { %v1250_v26 = vpop.f32.mrf.mxu2  ;;  %v578_v51 = vmul.f32 %v1226_v13, %v1226_v13  ;;  %v507_v54 = vadd.f32 %v506_v50, %v1226_v13  ;;  %v1298_v56 = vpop.f32.mrf.mxu3 }
  0xb4   :  { %1955 = vst [vmem:[#allocation14_spill] sm:$0xff] %v1298_v56 }
  0xb5   :  { %v641_v57 = vadd.f32 %v640_v53, %v578_v51 }
  0xba   :  { %v1231_v16 = vpop.f32.mrf.mxu0  ;;  %v1240_v21 = vpop.f32.mrf.mxu1 }
  0xbb   :  { %v1260_v31 = vpop.f32.mrf.mxu2  ;;  %v579_v55 = vmul.f32 %v1231_v16, %v1231_v16  ;;  %v508_v60 = vadd.f32 %v507_v54, %v1231_v16  ;;  %v1323_v46 = vpop.f32.mrf.mxu3 }
  0xbc   :  { %1957 = vst [vmem:[#allocation16_spill] sm:$0xff] %v1323_v46 }
  0xbd   :  { %v642_v1 = vadd.f32 %v641_v57, %v579_v55 }
  0xc2   :  { %v1238_v20 = vpop.f32.mrf.mxu0  ;;  %v1248_v25 = vpop.f32.mrf.mxu1 }
  0xc3   :  { %1949 = vst [vmem:[#allocation8_spill] sm:$0xff] %v1248_v25  ;;  %v1268_v35 = vpop.f32.mrf.mxu2  ;;  %v580_v61 = vmul.f32 %v1238_v20, %v1238_v20  ;;  %v509_v4 = vadd.f32 %v508_v60, %v1238_v20 }
  0xc5   :  { %v643_v7 = vadd.f32 %v642_v1, %v580_v61 }
  0xca   :  { %v1244_v23 = vpop.f32.mrf.mxu0  ;;  %v1256_v29 = vpop.f32.mrf.mxu1 }
  0xcb   :  { %1951 = vst [vmem:[#allocation10_spill] sm:$0xff] %v1256_v29  ;;  %v1293_v52 = vpop.f32.mrf.mxu2  ;;  %v581_v5 = vmul.f32 %v1244_v23, %v1244_v23  ;;  %v510_v11 = vadd.f32 %v509_v4, %v1244_v23 }
  0xcc   :  { %1954 = vst [vmem:[#allocation13_spill] sm:$0xff] %v1293_v52 }
  0xcd   :  { %v644_v36 = vadd.f32 %v643_v7, %v581_v5 }
  0xd2   :  { %v1252_v27 = vpop.f32.mrf.mxu0  ;;  %v1266_v34 = vpop.f32.mrf.mxu1 }
  0xd3   :  { %1953 = vst [vmem:[#allocation12_spill] sm:$0xff] %v1266_v34  ;;  %v582_v15 = vmul.f32 %v1252_v27, %v1252_v27  ;;  %v511_v38 = vadd.f32 %v510_v11, %v1252_v27  ;;  %v1316_v40 = vpop.f32.mrf.mxu2 }
  0xd4   :  { %1956 = vst [vmem:[#allocation15_spill] sm:$0xff] %v1316_v40 }
  0xd5   :  { %v645_v41 = vadd.f32 %v644_v36, %v582_v15 }
  0xda   :  { %v1258_v30 = vpop.f32.mrf.mxu0  ;;  %v1288_v48 = vpop.f32.mrf.mxu1 }
  0xdb   :  { %v583_v39 = vmul.f32 %v1258_v30, %v1258_v30  ;;  %v512_v42 = vadd.f32 %v511_v38, %v1258_v30  ;;  %v1339_v7 = vpop.f32.mrf.mxu2  ;;  %v1344_v38 = vpop.f32.mrf.mxu3 }
  0xdc   :  { %1958 = vst [vmem:[#allocation17_spill] sm:$0xff] %v1344_v38 }
  0xdd   :  { %v646_v47 = vadd.f32 %v645_v41, %v583_v39  ;;  %v589_v39 = vmul.f32 %v1198_v59, %v1198_v59 }
  0xe2   :  { %v1264_v33 = vpop.f32.mrf.mxu0  ;;  %v1311_v19 = vpop.f32.mrf.mxu1 }
  0xe3   :  { %v584_v43 = vmul.f32 %v1264_v33, %v1264_v33  ;;  %v513_v49 = vadd.f32 %v512_v42, %v1264_v33 }
  0xe5   :  { %v647_v51 = vadd.f32 %v646_v47, %v584_v43  ;;  %v590_v43 = vmul.f32 %v1204_v63, %v1204_v63 }
  0xea   :  { %v1283_v44 = vpop.f32.mrf.mxu0  ;;  %v1334_v61 = vpop.f32.mrf.mxu1 }
  0xeb   :  { %v585_v50 = vmul.f32 %v1283_v44, %v1283_v44  ;;  %v514_v53 = vadd.f32 %v513_v49, %v1283_v44 }
  0xed   :  { %v648_v55 = vadd.f32 %v647_v51, %v585_v50  ;;  %v591_v50 = vmul.f32 %v1210_v3, %v1210_v3 }
  0xf2   :  { %v1303_v0 = vpop.f32.mrf.mxu0 }
  0xf3   :  { %v586_v54 = vmul.f32 %v1303_v0, %v1303_v0  ;;  %v515_v57 = vadd.f32 %v514_v53, %v1303_v0 }
  0xf5   :  { %v649_v1 = vadd.f32 %v648_v55, %v586_v54  ;;  %v1355_v54 = vpop.f32.mrf.mxu1  ;;  %v592_v55 = vmul.f32 %v1216_v8, %v1216_v8 }
  0xf6   :  { %1959 = vst [vmem:[#allocation18_spill] sm:$0xff] %v1355_v54 }
  0xfa   :  { %v1321_v45 = vpop.f32.mrf.mxu0 }
  0xfb   :  { %v587_v60 = vmul.f32 %v1321_v45, %v1321_v45  ;;  %v516_v4 = vadd.f32 %v515_v57, %v1321_v45 }
  0xfd   :  { %v650_v11 = vadd.f32 %v649_v1, %v587_v60  ;;  %v1360_v1 = vpop.f32.mrf.mxu2 }
 0x102   :  { %v1337_v5 = vpop.f32.mrf.mxu0 }
 0x103   :  { %v517_v15 = vadd.f32 %v516_v4, %v1337_v5  ;;  %v588_v36 = vmul.f32 %v1337_v5, %v1337_v5  ;;  %v593_v4 = vmul.f32 %v1224_v12, %v1224_v12 }
 0x105   :  { %v518_v41 = vadd.f32 %v517_v15, %v1198_v59  ;;  %v651_v42 = vadd.f32 %v650_v11, %v588_v36  ;;  %v1365_v36 = vpop.f32.mrf.mxu3 }
 0x106   :  { %1960 = vst [vmem:[#allocation19_spill] sm:$0xff] %v1365_v36 }
 0x107   :  { %v519_v47 = vadd.f32 %v518_v41, %v1204_v63  ;;  %v652_v49 = vadd.f32 %v651_v42, %v589_v39  ;;  %v594_v39 = vmul.f32 %v1233_v17, %v1233_v17 }
 0x109   :  { %v520_v51 = vadd.f32 %v519_v47, %v1210_v3  ;;  %v653_v53 = vadd.f32 %v652_v49, %v590_v43  ;;  %v595_v43 = vmul.f32 %v1240_v21, %v1240_v21 }
 0x10b   :  { %v521_v57 = vadd.f32 %v520_v51, %v1216_v8  ;;  %v654_v60 = vadd.f32 %v653_v53, %v591_v50  ;;  %v596_v50 = vmul.f32 %v1248_v25, %v1248_v25 }
 0x10d   :  { %v522_v11 = vadd.f32 %v521_v57, %v1224_v12  ;;  %v655_v15 = vadd.f32 %v654_v60, %v592_v55  ;;  %v1376_v55 = vpop.f32.mrf.mxu1  ;;  %v597_v57 = vmul.f32 %v1256_v29, %v1256_v29 }
 0x10e   :  { %1961 = vst [vmem:[#allocation20_spill] sm:$0xff] %v1376_v55 }
 0x10f   :  { %v523_v41 = vadd.f32 %v522_v11, %v1233_v17  ;;  %v656_v42 = vadd.f32 %v655_v15, %v593_v4  ;;  %v1381_v11 = vpop.f32.mrf.mxu2  ;;  %v598_v15 = vmul.f32 %v1266_v34, %v1266_v34 }
 0x111   :  { %v657_v47 = vadd.f32 %v656_v42, %v594_v39  ;;  %v524_v49 = vadd.f32 %v523_v41, %v1240_v21  ;;  %v1386_v42 = vpop.f32.mrf.mxu3 }
 0x112   :  { %1962 = vst [vmem:[#allocation21_spill] sm:$0xff] %v1386_v42 }
 0x113   :  { %v525_v51 = vadd.f32 %v524_v49, %v1248_v25  ;;  %v658_v53 = vadd.f32 %v657_v47, %v595_v43  ;;  %v599_v43 = vmul.f32 %v1288_v48, %v1288_v48 }
 0x115   :  { %v526_v60 = vadd.f32 %v525_v51, %v1256_v29  ;;  %v659_v4 = vadd.f32 %v658_v53, %v596_v50  ;;  %v600_v50 = vmul.f32 %v1311_v19, %v1311_v19 }
 0x117   :  { %v527_v39 = vadd.f32 %v526_v60, %v1266_v34  ;;  %v660_v41 = vadd.f32 %v659_v4, %v597_v57  ;;  %v601_v57 = vmul.f32 %v1334_v61, %v1334_v61  ;;  %v1397_v60 = vpop.f32.mrf.mxu1 }
 0x119   :  { %v528_v47 = vadd.f32 %v527_v39, %v1288_v48  ;;  %v661_v49 = vadd.f32 %v660_v41, %v598_v15  ;;  %v602_v15 = vmul.f32 %v1355_v54, %v1355_v54  ;;  %v1402_v39 = vpop.f32.mrf.mxu2 }
 0x11b   :  { %v529_v25 = vadd.f32 %v528_v47, %v1311_v19  ;;  %v662_v51 = vadd.f32 %v661_v49, %v599_v43  ;;  %v603_v43 = vmul.f32 %v1376_v55, %v1376_v55  ;;  %v1409_v49 = vpop.f32.mrf.mxu3 }
 0x11c   :  { %1963 = vst [vmem:[#allocation22_spill] sm:$0xff] %v1409_v49 }
 0x11d   :  { %v663_v53 = vadd.f32 %v662_v51, %v600_v50  ;;  %v530_v29 = vadd.f32 %v529_v25, %v1334_v61  ;;  %v604_v25 = vmul.f32 %v1397_v60, %v1397_v60 }
 0x11f   :  { %v664_v4 = vadd.f32 %v663_v53, %v601_v57  ;;  %v531_v34 = vadd.f32 %v530_v29, %v1355_v54  ;;  %v605_v29 = vmul.f32 %v1221_v10, %v1221_v10 }
 0x121   :  { %v665_v41 = vadd.f32 %v664_v4, %v602_v15  ;;  %v532_v47 = vadd.f32 %v531_v34, %v1376_v55  ;;  %v606_v34 = vmul.f32 %v1228_v14, %v1228_v14  ;;  %v607_v55 = vmul.f32 %v1235_v18, %v1235_v18 }
 0x123   :  { %v666_v50 = vadd.f32 %v665_v41, %v603_v43  ;;  %v533_v51 = vadd.f32 %v532_v47, %v1397_v60  ;;  %v1421_v43 = vpop.f32.mrf.mxu2  ;;  %v608_v47 = vmul.f32 %v1242_v22, %v1242_v22 }
 0x125   :  { %v534_v53 = vadd.f32 %v533_v51, %v1221_v10  ;;  %v667_v57 = vadd.f32 %v666_v50, %v604_v25  ;;  %v1426_v50 = vpop.f32.mrf.mxu3 }
 0x126   :  { %1964 = vst [vmem:[#allocation23_spill] sm:$0xff] %v1426_v50 }
 0x127   :  { %v535_v4 = vadd.f32 %v534_v53, %v1228_v14  ;;  %v668_v15 = vadd.f32 %v667_v57, %v605_v29  ;;  %v609_v53 = vmul.f32 %v1250_v26, %v1250_v26 }
 0x129   :  { %v536_v54 = vadd.f32 %v535_v4, %v1235_v18  ;;  %v669_v41 = vadd.f32 %v668_v15, %v606_v34  ;;  %v610_v4 = vmul.f32 %v1260_v31, %v1260_v31  ;;  %v611_v18 = vmul.f32 %v1268_v35, %v1268_v35 }
 0x12b   :  { %v537_v51 = vadd.f32 %v536_v54, %v1242_v22  ;;  %v670_v25 = vadd.f32 %v669_v41, %v607_v55  ;;  %v612_v55 = vmul.f32 %v1293_v52, %v1293_v52 }
 0x12d   :  { %v538_v29 = vadd.f32 %v537_v51, %v1250_v26  ;;  %v671_v57 = vadd.f32 %v670_v25, %v608_v47  ;;  %v1440_v51 = vpop.f32.mrf.mxu2  ;;  %v613_v47 = vmul.f32 %v1316_v40, %v1316_v40 }
 0x12e   :  { %1965 = vst [vmem:[#allocation24_spill] sm:$0xff] %v1440_v51 }
 0x12f   :  { %v539_v34 = vadd.f32 %v538_v29, %v1260_v31  ;;  %v672_v15 = vadd.f32 %v671_v57, %v609_v53  ;;  %v1445_v29 = vpop.f32.mrf.mxu3  ;;  %v614_v57 = vmul.f32 %v1339_v7, %v1339_v7 }
 0x130   :  { %1966 = vst [vmem:[#allocation25_spill] sm:$0xff] %v1445_v29 }
 0x131   :  { %v673_v14 = vadd.f32 %v672_v15, %v610_v4  ;;  %v540_v54 = vadd.f32 %v539_v34, %v1268_v35  ;;  %v615_v15 = vmul.f32 %v1360_v1, %v1360_v1 }
 0x133   :  { %v541_v41 = vadd.f32 %v540_v54, %v1293_v52  ;;  %v674_v22 = vadd.f32 %v673_v14, %v611_v18  ;;  %v617_v52 = vmul.f32 %v1402_v39, %v1402_v39 }
 0x135   :  { %v542_v25 = vadd.f32 %v541_v41, %v1316_v40  ;;  %v675_v53 = vadd.f32 %v674_v22, %v612_v55  ;;  %v616_v41 = vmul.f32 %v1381_v11, %v1381_v11 }
 0x137   :  { %v543_v4 = vadd.f32 %v542_v25, %v1339_v7  ;;  %v676_v34 = vadd.f32 %v675_v53, %v613_v47  ;;  %v1459_v25 = vpop.f32.mrf.mxu2 }
 0x139   :  { %v544_v14 = vadd.f32 %v543_v4, %v1360_v1  ;;  %v677_v18 = vadd.f32 %v676_v34, %v614_v57  ;;  %v618_v57 = vmul.f32 %v1421_v43, %v1421_v43  ;;  %v1464_v4 = vpop.f32.mrf.mxu3 }
 0x13a   :  { %1967 = vst [vmem:[#allocation26_spill] sm:$0xff] %v1464_v4 }
 0x13b   :  { %v545_v54 = vadd.f32 %v544_v14, %v1381_v11  ;;  %v678_v22 = vadd.f32 %v677_v18, %v615_v15  ;;  %v619_v15 = vmul.f32 %v1440_v51, %v1440_v51  ;;  %v620_v18 = vmul.f32 %v1459_v25, %v1459_v25 }
 0x13d   :  { %v679_v55 = vadd.f32 %v678_v22, %v616_v41  ;;  %v546_v40 = vadd.f32 %v545_v54, %v1402_v39 }
 0x13f   :  { %v680_v47 = vadd.f32 %v679_v55, %v617_v52  ;;  %v547_v53 = vadd.f32 %v546_v40, %v1421_v43  ;;  %v621_v52 = vmul.f32 %v1246_v24, %v1246_v24  ;;  %v622_v55 = vmul.f32 %v1254_v28, %v1254_v28 }
 0x141   :  { %v681_v34 = vadd.f32 %v680_v47, %v618_v57  ;;  %v548_v14 = vadd.f32 %v547_v53, %v1440_v51  ;;  %v623_v57 = vmul.f32 %v1262_v32, %v1262_v32 }
 0x143   :  { %v682_v54 = vadd.f32 %v681_v34, %v619_v15  ;;  %v549_v41 = vadd.f32 %v548_v14, %v1459_v25  ;;  %v1481_v15 = vpop.f32.mrf.mxu3  ;;  %v624_v14 = vmul.f32 %v1272_v37, %v1272_v37 }
 0x144   :  { %1968 = vst [vmem:[#allocation27_spill] sm:$0xff] %v1481_v15 }
 0x145   :  { %v550_v40 = vadd.f32 %v549_v41, %v1246_v24  ;;  %v683_v22 = vadd.f32 %v682_v54, %v620_v18  ;;  %v625_v54 = vmul.f32 %v1298_v56, %v1298_v56 }
 0x147   :  { %v551_v47 = vadd.f32 %v550_v40, %v1254_v28  ;;  %v684_v53 = vadd.f32 %v683_v22, %v621_v52  ;;  %v626_v22 = vmul.f32 %v1323_v46, %v1323_v46 }
 0x149   :  { %v552_v51 = vadd.f32 %v551_v47, %v1262_v32  ;;  %v685_v34 = vadd.f32 %v684_v53, %v622_v55  ;;  %v627_v53 = vmul.f32 %v1344_v38, %v1344_v38 }
 0x14b   :  { %v553_v41 = vadd.f32 %v552_v51, %v1272_v37  ;;  %v686_v18 = vadd.f32 %v685_v34, %v623_v57  ;;  %v628_v51 = vmul.f32 %v1365_v36, %v1365_v36 }
 0x14d   :  { %v554_v40 = vadd.f32 %v553_v41, %v1298_v56  ;;  %v687_v52 = vadd.f32 %v686_v18, %v624_v14  ;;  %v1498_v41 = vpop.f32.mrf.mxu3  ;;  %v629_v14 = vmul.f32 %v1386_v42, %v1386_v42 }
 0x14e   :  { %1969 = vst [vmem:[#allocation28_spill] sm:$0xff] %v1498_v41 }
 0x14f   :  { %v555_v47 = vadd.f32 %v554_v40, %v1323_v46  ;;  %v688_v55 = vadd.f32 %v687_v52, %v625_v54  ;;  %v630_v40 = vmul.f32 %v1409_v49, %v1409_v49 }
 0x151   :  { %v689_v32 = vadd.f32 %v688_v55, %v626_v22  ;;  %v556_v28 = vadd.f32 %v555_v47, %v1344_v38  ;;  %v631_v47 = vmul.f32 %v1426_v50, %v1426_v50 }
 0x153   :  { %v557_v57 = vadd.f32 %v556_v28, %v1365_v36  ;;  %v690_v34 = vadd.f32 %v689_v32, %v627_v53  ;;  %v632_v53 = vmul.f32 %v1445_v29, %v1445_v29 }
 0x155   :  { %v558_v18 = vadd.f32 %v557_v57, %v1386_v42  ;;  %v691_v54 = vadd.f32 %v690_v34, %v628_v51  ;;  %v633_v34 = vmul.f32 %v1464_v4, %v1464_v4 }
 0x157   :  { %v559_v52 = vadd.f32 %v558_v18, %v1409_v49  ;;  %v692_v22 = vadd.f32 %v691_v54, %v629_v14  ;;  %v500_v18 = vpop.f32.mrf.mxu3 }
 0x159   :  { %v560_v28 = vadd.f32 %v559_v52, %v1426_v50  ;;  %v693_v32 = vadd.f32 %v692_v22, %v630_v40  ;;  %v634_v52 = vmul.f32 %v1481_v15, %v1481_v15 }
 0x15b   :  { %v561_v55 = vadd.f32 %v560_v28, %v1445_v29  ;;  %v694_v36 = vadd.f32 %v693_v32, %v631_v47  ;;  %v635_v28 = vmul.f32 %v1498_v41, %v1498_v41  ;;  %v636_v47 = vmul.f32 %v500_v18, %v500_v18 }
 0x15d   :  { %v695_v57 = vadd.f32 %v694_v36, %v632_v53  ;;  %v562_v51 = vadd.f32 %v561_v55, %v1464_v4 }
 0x15f   :  { %v696_v14 = vadd.f32 %v695_v57, %v633_v34  ;;  %v563_v54 = vadd.f32 %v562_v51, %v1481_v15 }
 0x161   :  { %v697_v40 = vadd.f32 %v696_v14, %v634_v52  ;;  %v564_v22 = vadd.f32 %v563_v54, %v1498_v41 }
 0x163   :  { %v698_v36 = vadd.f32 %v697_v40, %v635_v28  ;;  %v565_v32 = vadd.f32 %v564_v22, %v500_v18 }
 0x165   :  { %v566_v55 = vrot.slane %v565_v32, 4  ;;  %v699_v53 = vadd.f32 %v698_v36, %v636_v47 }
 0x167   :  { %v567_v29 = vadd.f32 %v566_v55, %v565_v32  ;;  %v700_v4 = vrot.slane %v699_v53, 4 }
 0x169   :  { %v568_v50 = vrot.slane %v567_v29, 2  ;;  %v701_v57 = vadd.f32 %v700_v4, %v699_v53 }
 0x16b   :  { %v569_v34 = vadd.f32 %v568_v50, %v567_v29  ;;  %v702_v51 = vrot.slane %v701_v57, 2 }
 0x16d   :  { %v570_v49 = vrot.slane %v569_v34, 1  ;;  %v703_v42 = vadd.f32 %v702_v51, %v701_v57 }
 0x16f   :  { %v571_v15 = vadd.f32 %v570_v49, %v569_v34  ;;  %v704_v14 = vrot.slane %v703_v42, 1  ;;  %v709_v49 = vld [vmem:[%s1919_s2] sm:$0x1] }
 0x171   :  { %v572_v52 = vmul.f32 0.001953125, %v571_v15  ;;  %v705_v54 = vadd.f32 %v704_v14, %v703_v42 }
 0x173   :  { %v706_v38 = vmul.f32 0.001953125, %v705_v54  ;;  %v707_v46 = vmul.f32 %v572_v52, %v572_v52 }
 0x175   :  { %v708_v41 = vsub.f32 %v706_v38, %v707_v46  ;;  %v722_v46 = vld [vmem:[%s1920_s3] sm:$0x1] }
 0x177   :  { %v710_v56 = vadd.f32 0.001, %v708_v41 }
 0x179   :  { %1071 = vrsqrt.f32 %v710_v56  ;;  %vm717_vm2 = vweird.f32 %v710_v56 }
 0x17f   :  { %v1072_v40 = vpop.eup %1071 }
 0x180   :  { %v712_v22 = vmul.f32 %v1072_v40, %v710_v56  ;;  %vm718_vm1 = vweird.f32 %v1072_v40 }
 0x181   :  { %vm719_vm3 = vmor %vm717_vm2, %vm718_vm1 }
 0x182   :  { %v713_v28 = vmul.f32 %v1072_v40, %v712_v22 }
 0x184   :  { %v714_v47 = vmul.f32 0.5, %v713_v28 }
 0x186   :  { %v715_v36 = vsub.f32 1.5, %v714_v47 }
 0x188   :  { %v716_v32 = vmul.f32 %v1072_v40, %v715_v36 }
 0x18a   :  { %v720_v50 = vsel %vm719_vm3, %v1072_v40, %v716_v32 }
 0x18b   :  { %v721_v42 = vmul.f32 %v720_v50, %v709_v49 }
 0x18d   :  { %v723_v29 = vmul.f32 %v721_v42, %v572_v52  ;;  %v1527_v4 = vperm.slane %v721_v42, 0 }
 0x18f   :  { %v724_v38 = vsub.f32 %v722_v46, %v723_v29  ;;  %v728_v56 = vmul.f32 %v1527_v4, %v1196_v58  ;;  %v729_v41 = vmul.f32 %v1527_v4, %v1202_v62  ;;  %v730_v55 = vmul.f32 %v1527_v4, %v1208_v2 }
 0x190   :  { %v731_v53 = vmul.f32 %v1527_v4, %v1214_v6  ;;  %v732_v57 = vmul.f32 %v1527_v4, %v1219_v9  ;;  %v733_v58 = vmul.f32 %v1527_v4, %v1226_v13  ;;  %v791_v62 = vmul.f32 %v1527_v4, %v500_v18 }
 0x191   :  { %v1529_v15 = vperm.slane %v724_v38, 0  ;;  %v734_v2 = vmul.f32 %v1527_v4, %v1231_v16  ;;  %v735_v9 = vmul.f32 %v1527_v4, %v1238_v20  ;;  %v736_v54 = vmul.f32 %v1527_v4, %v1244_v23 }
 0x192   :  { %v737_v16 = vmul.f32 %v1527_v4, %v1252_v27  ;;  %v738_v20 = vmul.f32 %v1527_v4, %v1258_v30  ;;  %v739_v50 = vmul.f32 %v1527_v4, %v1264_v33  ;;  %v740_v27 = vmul.f32 %v1527_v4, %v1283_v44 }
 0x193   :  { %v795_v34 = vadd.f32 %v1529_v15, %v728_v56  ;;  %v796_v51 = vadd.f32 %v1529_v15, %v729_v41  ;;  %v797_v14 = vadd.f32 %v1529_v15, %v730_v55  ;;  %v798_v52 = vadd.f32 %v1529_v15, %v731_v53 }
 0x194   :  { %v799_v6 = vadd.f32 %v1529_v15, %v732_v57  ;;  %v800_v40 = vadd.f32 %v1529_v15, %v733_v58  ;;  %v1557_v22 = vadd.f32 %v1529_v15, %v791_v62  ;;  %v801_v13 = vadd.f32 %v1529_v15, %v734_v2 }
 0x195   :  { %v859_v18 = vmax.f32 %v795_v34, 0.0  ;;  %v860_v28 = vmax.f32 %v796_v51, 0.0  ;;  %v861_v47 = vmax.f32 %v797_v14, 0.0  ;;  %v802_v36 = vadd.f32 %v1529_v15, %v735_v9 }
 0x196   :  { %v862_v32 = vmax.f32 %v798_v52, 0.0  ;;  %v803_v23 = vadd.f32 %v1529_v15, %v736_v54  ;;  %v863_v49 = vmax.f32 %v799_v6, 0.0  ;;  %v804_v42 = vadd.f32 %v1529_v15, %v737_v16 }
 0x197   :  { %923 = vst [vmem:[%s1921_s4] sm:$0xff] %v859_v18  ;;  %v864_v29 = vmax.f32 %v800_v40, 0.0  ;;  %v805_v30 = vadd.f32 %v1529_v15, %v738_v20  ;;  %v865_v46 = vmax.f32 %v801_v13, 0.0  ;;  %v741_v33 = vmul.f32 %v1527_v4, %v1303_v0 }
 0x198   :  { %924 = vst [vmem:[%s1921_s4 + $0x8] sm:$0xff] %v860_v28  ;;  %v806_v38 = vadd.f32 %v1529_v15, %v739_v50  ;;  %v866_v56 = vmax.f32 %v802_v36, 0.0  ;;  %v742_v44 = vmul.f32 %v1527_v4, %v1321_v45  ;;  %v807_v41 = vadd.f32 %v1529_v15, %v740_v27 }
 0x199   :  { %925 = vst [vmem:[%s1921_s4 + $0x10] sm:$0xff] %v861_v47  ;;  %v867_v55 = vmax.f32 %v803_v23, 0.0  ;;  %v743_v0 = vmul.f32 %v1527_v4, %v1337_v5  ;;  %v808_v53 = vadd.f32 %v1529_v15, %v741_v33  ;;  %v868_v57 = vmax.f32 %v804_v42, 0.0  ;;  %v1970_v47 = vld [vmem:[#allocation8_spill] sm:$0xff] }
 0x19a   :  { %926 = vst [vmem:[%s1921_s4 + $0x18] sm:$0xff] %v862_v32  ;;  %v744_v45 = vmul.f32 %v1527_v4, %v1198_v59  ;;  %v809_v34 = vadd.f32 %v1529_v15, %v742_v44  ;;  %v869_v51 = vmax.f32 %v805_v30, 0.0  ;;  %v745_v5 = vmul.f32 %v1527_v4, %v1204_v63  ;;  %v1971_v32 = vld [vmem:[#allocation10_spill] sm:$0xff] }
 0x19b   :  { %927 = vst [vmem:[%s1921_s4 + $0x20] sm:$0xff] %v863_v49  ;;  %v810_v14 = vadd.f32 %v1529_v15, %v743_v0  ;;  %v870_v58 = vmax.f32 %v806_v38, 0.0  ;;  %v746_v59 = vmul.f32 %v1527_v4, %v1210_v3  ;;  %v871_v52 = vmax.f32 %v807_v41, 0.0  ;;  %v1972_v49 = vld [vmem:[#allocation12_spill] sm:$0xff] }
 0x19c   :  { %928 = vst [vmem:[%s1921_s4 + $0x28] sm:$0xff] %v864_v29  ;;  %v811_v62 = vadd.f32 %v1529_v15, %v744_v45  ;;  %v747_v63 = vmul.f32 %v1527_v4, %v1216_v8  ;;  %v812_v2 = vadd.f32 %v1529_v15, %v745_v5  ;;  %v872_v6 = vmax.f32 %v808_v53, 0.0 }
 0x19d   :  { %929 = vst [vmem:[%s1921_s4 + $0x30] sm:$0xff] %v865_v46  ;;  %v748_v3 = vmul.f32 %v1527_v4, %v1224_v12  ;;  %v813_v9 = vadd.f32 %v1529_v15, %v746_v59  ;;  %v873_v54 = vmax.f32 %v809_v34, 0.0  ;;  %v749_v8 = vmul.f32 %v1527_v4, %v1233_v17 }
 0x19e   :  { %930 = vst [vmem:[%s1921_s4 + $0x38] sm:$0xff] %v866_v56  ;;  %v814_v40 = vadd.f32 %v1529_v15, %v747_v63  ;;  %v874_v13 = vmax.f32 %v810_v14, 0.0  ;;  %v750_v12 = vmul.f32 %v1527_v4, %v1240_v21  ;;  %v875_v28 = vmax.f32 %v811_v62, 0.0 }
 0x19f   :  { %931 = vst [vmem:[%s1921_s4 + $0x40] sm:$0xff] %v867_v55  ;;  %v815_v18 = vadd.f32 %v1529_v15, %v748_v3  ;;  %v751_v17 = vmul.f32 %v1527_v4, %v1970_v47  ;;  %v816_v16 = vadd.f32 %v1529_v15, %v749_v8  ;;  %v876_v36 = vmax.f32 %v812_v2, 0.0  ;;  %v1973_v55 = vld [vmem:[#allocation18_spill] sm:$0xff] }
 0x1a0   :  { %932 = vst [vmem:[%s1921_s4 + $0x48] sm:$0xff] %v868_v57  ;;  %v752_v21 = vmul.f32 %v1527_v4, %v1971_v32  ;;  %v817_v20 = vadd.f32 %v1529_v15, %v750_v12  ;;  %v877_v23 = vmax.f32 %v813_v9, 0.0  ;;  %v753_v50 = vmul.f32 %v1527_v4, %v1972_v49  ;;  %v1974_v57 = vld [vmem:[#allocation20_spill] sm:$0xff]  ;;  %v1979_v49 = vld [vmem:[#allocation15_spill] sm:$0xff] }
 0x1a1   :  { %933 = vst [vmem:[%s1921_s4 + $0x50] sm:$0xff] %v869_v51  ;;  %v818_v42 = vadd.f32 %v1529_v15, %v751_v17  ;;  %v878_v29 = vmax.f32 %v814_v40, 0.0  ;;  %v754_v27 = vmul.f32 %v1527_v4, %v1288_v48  ;;  %v879_v46 = vmax.f32 %v815_v18, 0.0 }
 0x1a2   :  { %934 = vst [vmem:[%s1921_s4 + $0x58] sm:$0xff] %v870_v58  ;;  %v819_v30 = vadd.f32 %v1529_v15, %v752_v21  ;;  %v755_v33 = vmul.f32 %v1527_v4, %v1311_v19  ;;  %v820_v38 = vadd.f32 %v1529_v15, %v753_v50  ;;  %v880_v56 = vmax.f32 %v816_v16, 0.0  ;;  %v1978_v21 = vld [vmem:[#allocation13_spill] sm:$0xff] }
 0x1a3   :  { %935 = vst [vmem:[%s1921_s4 + $0x60] sm:$0xff] %v871_v52  ;;  %v756_v48 = vmul.f32 %v1527_v4, %v1334_v61  ;;  %v821_v44 = vadd.f32 %v1529_v15, %v754_v27  ;;  %v881_v41 = vmax.f32 %v817_v20, 0.0  ;;  %v757_v19 = vmul.f32 %v1527_v4, %v1973_v55  ;;  %v1975_v52 = vld [vmem:[#allocation5_spill] sm:$0xff] }
 0x1a4   :  { %936 = vst [vmem:[%s1921_s4 + $0x68] sm:$0xff] %v872_v6  ;;  %v822_v0 = vadd.f32 %v1529_v15, %v755_v33  ;;  %v882_v53 = vmax.f32 %v818_v42, 0.0  ;;  %v758_v61 = vmul.f32 %v1527_v4, %v1974_v57  ;;  %v883_v34 = vmax.f32 %v819_v30, 0.0  ;;  %v1976_v6 = vld [vmem:[#allocation6_spill] sm:$0xff] }
 0x1a5   :  { %937 = vst [vmem:[%s1921_s4 + $0x70] sm:$0xff] %v873_v54  ;;  %v823_v45 = vadd.f32 %v1529_v15, %v756_v48  ;;  %v759_v51 = vmul.f32 %v1527_v4, %v1397_v60  ;;  %v824_v5 = vadd.f32 %v1529_v15, %v757_v19  ;;  %v884_v14 = vmax.f32 %v820_v38, 0.0  ;;  %v1977_v54 = vld [vmem:[#allocation7_spill] sm:$0xff] }
 0x1a6   :  { %938 = vst [vmem:[%s1921_s4 + $0x78] sm:$0xff] %v874_v13  ;;  %v760_v58 = vmul.f32 %v1527_v4, %v1221_v10  ;;  %v825_v59 = vadd.f32 %v1529_v15, %v758_v61  ;;  %v885_v62 = vmax.f32 %v821_v44, 0.0  ;;  %v761_v60 = vmul.f32 %v1527_v4, %v1975_v52 }
 0x1a7   :  { %939 = vst [vmem:[%s1921_s4 + $0x80] sm:$0xff] %v875_v28  ;;  %v826_v63 = vadd.f32 %v1529_v15, %v759_v51  ;;  %v886_v2 = vmax.f32 %v822_v0, 0.0  ;;  %v762_v10 = vmul.f32 %v1527_v4, %v1976_v6  ;;  %v887_v9 = vmax.f32 %v823_v45, 0.0  ;;  %v1980_v0 = vld [vmem:[#allocation24_spill] sm:$0xff] }
 0x1a8   :  { %940 = vst [vmem:[%s1921_s4 + $0x88] sm:$0xff] %v876_v36  ;;  %v827_v3 = vadd.f32 %v1529_v15, %v760_v58  ;;  %v763_v8 = vmul.f32 %v1527_v4, %v1977_v54  ;;  %v828_v40 = vadd.f32 %v1529_v15, %v761_v60  ;;  %v888_v13 = vmax.f32 %v824_v5, 0.0 }
 0x1a9   :  { %941 = vst [vmem:[%s1921_s4 + $0x90] sm:$0xff] %v877_v23  ;;  %v764_v12 = vmul.f32 %v1527_v4, %v1250_v26  ;;  %v829_v18 = vadd.f32 %v1529_v15, %v762_v10  ;;  %v889_v28 = vmax.f32 %v825_v59, 0.0  ;;  %v765_v47 = vmul.f32 %v1527_v4, %v1260_v31  ;;  %v1983_v10 = vld [vmem:[#allocation14_spill] sm:$0xff] }
 0x1aa   :  { %942 = vst [vmem:[%s1921_s4 + $0x98] sm:$0xff] %v878_v29  ;;  %v830_v17 = vadd.f32 %v1529_v15, %v763_v8  ;;  %v890_v16 = vmax.f32 %v826_v63, 0.0  ;;  %v766_v26 = vmul.f32 %v1527_v4, %v1268_v35  ;;  %v891_v32 = vmax.f32 %v827_v3, 0.0  ;;  %v1984_v8 = vld [vmem:[#allocation16_spill] sm:$0xff] }
 0x1ab   :  { %943 = vst [vmem:[%s1921_s4 + $0xa0] sm:$0xff] %v879_v46  ;;  %v831_v36 = vadd.f32 %v1529_v15, %v764_v12  ;;  %v767_v31 = vmul.f32 %v1527_v4, %v1978_v21  ;;  %v832_v20 = vadd.f32 %v1529_v15, %v765_v47  ;;  %v892_v23 = vmax.f32 %v828_v40, 0.0  ;;  %v1985_v12 = vld [vmem:[#allocation17_spill] sm:$0xff] }
 0x1ac   :  { %944 = vst [vmem:[%s1921_s4 + $0xa8] sm:$0xff] %v880_v56  ;;  %v768_v35 = vmul.f32 %v1527_v4, %v1979_v49  ;;  %v833_v50 = vadd.f32 %v1529_v15, %v766_v26  ;;  %v893_v42 = vmax.f32 %v829_v18, 0.0  ;;  %v769_v29 = vmul.f32 %v1527_v4, %v1339_v7 }
 0x1ad   :  { %945 = vst [vmem:[%s1921_s4 + $0xb0] sm:$0xff] %v881_v41  ;;  %v834_v27 = vadd.f32 %v1529_v15, %v767_v31  ;;  %v894_v30 = vmax.f32 %v830_v17, 0.0  ;;  %v770_v46 = vmul.f32 %v1527_v4, %v1360_v1  ;;  %v895_v38 = vmax.f32 %v831_v36, 0.0  ;;  %v1986_v17 = vld [vmem:[#allocation19_spill] sm:$0xff] }
 0x1ae   :  { %946 = vst [vmem:[%s1921_s4 + $0xb8] sm:$0xff] %v882_v53  ;;  %v835_v33 = vadd.f32 %v1529_v15, %v768_v35  ;;  %v771_v7 = vmul.f32 %v1527_v4, %v1381_v11  ;;  %v836_v56 = vadd.f32 %v1529_v15, %v769_v29  ;;  %v896_v48 = vmax.f32 %v832_v20, 0.0 }
 0x1af   :  { %947 = vst [vmem:[%s1921_s4 + $0xc0] sm:$0xff] %v883_v34  ;;  %v772_v1 = vmul.f32 %v1527_v4, %v1402_v39  ;;  %v837_v44 = vadd.f32 %v1529_v15, %v770_v46  ;;  %v897_v41 = vmax.f32 %v833_v50, 0.0  ;;  %v773_v11 = vmul.f32 %v1527_v4, %v1421_v43  ;;  %v1990_v46 = vld [vmem:[#allocation25_spill] sm:$0xff] }
 0x1b0   :  { %948 = vst [vmem:[%s1921_s4 + $0xc8] sm:$0xff] %v884_v14  ;;  %v838_v55 = vadd.f32 %v1529_v15, %v771_v7  ;;  %v898_v19 = vmax.f32 %v834_v27, 0.0  ;;  %v774_v39 = vmul.f32 %v1527_v4, %v1980_v0  ;;  %v899_v57 = vmax.f32 %v835_v33, 0.0  ;;  %v1981_v14 = vld [vmem:[#allocation9_spill] sm:$0xff]  ;;  %v1993_v0 = vld [vmem:[#allocation28_spill] sm:$0xff] }
 0x1b1   :  { %949 = vst [vmem:[%s1921_s4 + $0xd0] sm:$0xff] %v885_v62  ;;  %v839_v53 = vadd.f32 %v1529_v15, %v772_v1  ;;  %v775_v43 = vmul.f32 %v1527_v4, %v1459_v25  ;;  %v840_v61 = vadd.f32 %v1529_v15, %v773_v11  ;;  %v900_v45 = vmax.f32 %v836_v56, 0.0  ;;  %v1982_v62 = vld [vmem:[#allocation11_spill] sm:$0xff]  ;;  %v1991_v56 = vld [vmem:[#allocation26_spill] sm:$0xff] }
 0x1b2   :  { %950 = vst [vmem:[%s1921_s4 + $0xd8] sm:$0xff] %v886_v2  ;;  %v776_v34 = vmul.f32 %v1527_v4, %v1246_v24  ;;  %v841_v51 = vadd.f32 %v1529_v15, %v774_v39  ;;  %v901_v5 = vmax.f32 %v837_v44, 0.0  ;;  %v777_v25 = vmul.f32 %v1527_v4, %v1981_v14 }
 0x1b3   :  { %951 = vst [vmem:[%s1921_s4 + $0xe0] sm:$0xff] %v887_v9  ;;  %v842_v58 = vadd.f32 %v1529_v15, %v775_v43  ;;  %v902_v59 = vmax.f32 %v838_v55, 0.0  ;;  %v778_v24 = vmul.f32 %v1527_v4, %v1982_v62  ;;  %v903_v60 = vmax.f32 %v839_v53, 0.0 }
 0x1b4   :  { %952 = vst [vmem:[%s1921_s4 + $0xe8] sm:$0xff] %v888_v13  ;;  %v843_v52 = vadd.f32 %v1529_v15, %v776_v34  ;;  %v779_v63 = vmul.f32 %v1527_v4, %v1272_v37  ;;  %v844_v2 = vadd.f32 %v1529_v15, %v777_v25  ;;  %v904_v6 = vmax.f32 %v840_v61, 0.0 }
 0x1b5   :  { %953 = vst [vmem:[%s1921_s4 + $0xf0] sm:$0xff] %v889_v28  ;;  %v780_v3 = vmul.f32 %v1527_v4, %v1983_v10  ;;  %v845_v9 = vadd.f32 %v1529_v15, %v778_v24  ;;  %v905_v54 = vmax.f32 %v841_v51, 0.0  ;;  %v781_v37 = vmul.f32 %v1527_v4, %v1984_v8 }
 0x1b6   :  { %954 = vst [vmem:[%s1921_s4 + $0xf8] sm:$0xff] %v890_v16  ;;  %v846_v40 = vadd.f32 %v1529_v15, %v779_v63  ;;  %v906_v13 = vmax.f32 %v842_v58, 0.0  ;;  %v782_v18 = vmul.f32 %v1527_v4, %v1985_v12  ;;  %v907_v47 = vmax.f32 %v843_v52, 0.0 }
 0x1b7   :  { %955 = vst [vmem:[%s1921_s4 + $0x100] sm:$0xff] %v891_v32  ;;  %v847_v28 = vadd.f32 %v1529_v15, %v780_v3  ;;  %v783_v16 = vmul.f32 %v1527_v4, %v1986_v17  ;;  %v848_v26 = vadd.f32 %v1529_v15, %v781_v37  ;;  %v908_v36 = vmax.f32 %v844_v2, 0.0  ;;  %v1987_v32 = vld [vmem:[#allocation21_spill] sm:$0xff] }
 0x1b8   :  { %956 = vst [vmem:[%s1921_s4 + $0x108] sm:$0xff] %v892_v23  ;;  %v784_v21 = vmul.f32 %v1527_v4, %v1987_v32  ;;  %v849_v31 = vadd.f32 %v1529_v15, %v782_v18  ;;  %v909_v20 = vmax.f32 %v845_v9, 0.0  ;;  %v1988_v23 = vld [vmem:[#allocation22_spill] sm:$0xff]  ;;  %v910_v50 = vmax.f32 %v846_v40, 0.0 }
 0x1b9   :  { %957 = vst [vmem:[%s1921_s4 + $0x110] sm:$0xff] %v893_v42  ;;  %v785_v49 = vmul.f32 %v1527_v4, %v1988_v23  ;;  %v850_v35 = vadd.f32 %v1529_v15, %v783_v16  ;;  %v1989_v42 = vld [vmem:[#allocation23_spill] sm:$0xff]  ;;  %v787_v33 = vmul.f32 %v1527_v4, %v1990_v46  ;;  %v912_v7 = vmax.f32 %v848_v26, 0.0 }
 0x1ba   :  { %958 = vst [vmem:[%s1921_s4 + $0x118] sm:$0xff] %v894_v30  ;;  %v786_v29 = vmul.f32 %v1527_v4, %v1989_v42  ;;  %v851_v27 = vadd.f32 %v1529_v15, %v784_v21  ;;  %v911_v30 = vmax.f32 %v847_v28, 0.0  ;;  %v913_v44 = vmax.f32 %v849_v31, 0.0 }
 0x1bb   :  { %959 = vst [vmem:[%s1921_s4 + $0x120] sm:$0xff] %v895_v38  ;;  %v852_v38 = vadd.f32 %v1529_v15, %v785_v49  ;;  %v854_v55 = vadd.f32 %v1529_v15, %v787_v33  ;;  %v790_v39 = vmul.f32 %v1527_v4, %v1993_v0  ;;  %v922_v14 = vmax.f32 %v1557_v22, 0.0 }
 0x1bc   :  { %960 = vst [vmem:[%s1921_s4 + $0x128] sm:$0xff] %v896_v48  ;;  %v788_v48 = vmul.f32 %v1527_v4, %v1991_v56  ;;  %v853_v1 = vadd.f32 %v1529_v15, %v786_v29 }
 0x1bd   :  { %961 = vst [vmem:[%s1921_s4 + $0x130] sm:$0xff] %v897_v41  ;;  %v1992_v41 = vld [vmem:[#allocation27_spill] sm:$0xff]  ;;  %v916_v61 = vmax.f32 %v852_v38, 0.0 }
 0x1be   :  { %962 = vst [vmem:[%s1921_s4 + $0x138] sm:$0xff] %v898_v19  ;;  %v789_v11 = vmul.f32 %v1527_v4, %v1992_v41  ;;  %v914_v19 = vmax.f32 %v850_v35, 0.0  ;;  %v855_v53 = vadd.f32 %v1529_v15, %v788_v48  ;;  %v917_v34 = vmax.f32 %v853_v1, 0.0 }
 0x1bf   :  { %963 = vst [vmem:[%s1921_s4 + $0x140] sm:$0xff] %v899_v57  ;;  %v915_v57 = vmax.f32 %v851_v27, 0.0  ;;  %v918_v4 = vmax.f32 %v854_v55, 0.0 }
 0x1c0   :  { %964 = vst [vmem:[%s1921_s4 + $0x148] sm:$0xff] %v900_v45  ;;  %v856_v43 = vadd.f32 %v1529_v15, %v789_v11  ;;  %v857_v45 = vadd.f32 %v1529_v15, %v790_v39  ;;  %v919_v51 = vmax.f32 %v855_v53, 0.0 }
 0x1c1   :  { %965 = vst [vmem:[%s1921_s4 + $0x150] sm:$0xff] %v901_v5 }
 0x1c2   :  { %966 = vst [vmem:[%s1921_s4 + $0x158] sm:$0xff] %v902_v59  ;;  %v920_v5 = vmax.f32 %v856_v43, 0.0  ;;  %v921_v15 = vmax.f32 %v857_v45, 0.0 }
 0x1c3   :  { %967 = vst [vmem:[%s1921_s4 + $0x160] sm:$0xff] %v903_v60 }
 0x1c4   :  { %968 = vst [vmem:[%s1921_s4 + $0x168] sm:$0xff] %v904_v6 }
 0x1c5   :  { %969 = vst [vmem:[%s1921_s4 + $0x170] sm:$0xff] %v905_v54 }
 0x1c6   :  { %970 = vst [vmem:[%s1921_s4 + $0x178] sm:$0xff] %v906_v13 }
 0x1c7   :  { %971 = vst [vmem:[%s1921_s4 + $0x180] sm:$0xff] %v907_v47 }
 0x1c8   :  { %972 = vst [vmem:[%s1921_s4 + $0x188] sm:$0xff] %v908_v36 }
 0x1c9   :  { %973 = vst [vmem:[%s1921_s4 + $0x190] sm:$0xff] %v909_v20 }
 0x1ca   :  { %974 = vst [vmem:[%s1921_s4 + $0x198] sm:$0xff] %v910_v50 }
 0x1cb   :  { %975 = vst [vmem:[%s1921_s4 + $0x1a0] sm:$0xff] %v911_v30 }
 0x1cc   :  { %976 = vst [vmem:[%s1921_s4 + $0x1a8] sm:$0xff] %v912_v7 }
 0x1cd   :  { %977 = vst [vmem:[%s1921_s4 + $0x1b0] sm:$0xff] %v913_v44 }
 0x1ce   :  { %978 = vst [vmem:[%s1921_s4 + $0x1b8] sm:$0xff] %v914_v19 }
 0x1cf   :  { %979 = vst [vmem:[%s1921_s4 + $0x1c0] sm:$0xff] %v915_v57 }
 0x1d0   :  { %980 = vst [vmem:[%s1921_s4 + $0x1c8] sm:$0xff] %v916_v61 }
 0x1d1   :  { %981 = vst [vmem:[%s1921_s4 + $0x1d0] sm:$0xff] %v917_v34 }
 0x1d2   :  { %982 = vst [vmem:[%s1921_s4 + $0x1d8] sm:$0xff] %v918_v4 }
 0x1d3   :  { %983 = vst [vmem:[%s1921_s4 + $0x1e0] sm:$0xff] %v919_v51 }
 0x1d4   :  { %984 = vst [vmem:[%s1921_s4 + $0x1e8] sm:$0xff] %v920_v5 }
 0x1d5   :  { %985 = vst [vmem:[%s1921_s4 + $0x1f0] sm:$0xff] %v921_v15 }
 0x1d6   :  { %986 = vst [vmem:[%s1921_s4 + $0x1f8] sm:$0xff] %v922_v14 }
 0x1d7   :  { %991 = vsyncpa [#allocation3], 1 }

</bundles_post_ra>
